<compile_context>
chip_gen: v7x
topology: tpu7x:2x2x1
jax: 0.10.0
libtpu: 0.0.40
codegen_flags: <defaults>
</compile_context>

<pallas_src>
import functools

import jax
import jax.numpy as jnp
from jax.experimental import pallas as pl
from jax.experimental.pallas import tpu as pltpu


def _global_attention_kernel(tgt_ref, src_ref, srcT_ref, wc_ref, attn_ref, *,
                             compute_dtype):
    """One (batch, query-tile) grid step.

    tgt_ref  : (1, idf, q_tile)      -- input feature tile, lane axis = queryL
    src_ref  : (1, idf, sourceL)     -- sourceT = conv1x1(context) (precomputed)
    srcT_ref : (1, sourceL, idf)     -- sourceT transposed (precomputed, tiny)
    wc_ref   : (1, idf, q_tile)      -- weightedContext tile
    attn_ref : (1, sourceL, q_tile)  -- attention tile (already "transposed" layout)
    """
    tgt = tgt_ref[0].astype(compute_dtype)      # (idf, qt)
    src = src_ref[0].astype(compute_dtype)      # (idf, sourceL)
    srcT = srcT_ref[0].astype(compute_dtype)    # (sourceL, idf)

    # scores^T = sourceT^T @ target : (sourceL, qt)
    scores = jnp.dot(srcT, tgt, preferred_element_type=jnp.float32)

    # softmax over sourceL (sublane axis 0) -- matches softmax over the last dim of
    # the PyTorch (queryL, sourceL) scores.
    m = jnp.max(scores, axis=0, keepdims=True)          # (1, qt)
    e = jnp.exp(scores - m)                             # (sourceL, qt)
    denom = jnp.sum(e, axis=0, keepdims=True)           # (1, qt)
    p = e * pl.reciprocal(denom, approx=True)           # (sourceL, qt), EUP divide

    # weightedContext = sourceT @ attn^T : (idf, qt)
    wc = jnp.dot(src, p.astype(compute_dtype), preferred_element_type=jnp.float32)

    wc_ref[0] = wc.astype(wc_ref.dtype)
    attn_ref[0] = p.astype(attn_ref.dtype)


def _pick_query_tile(queryL, target_tile):
    """Largest multiple of 128 <= target_tile that divides queryL; else whole queryL."""
    if queryL % 128 != 0:
        return queryL
    qt = max(min(target_tile - target_tile % 128, queryL), 128)
    while queryL % qt != 0:
        qt -= 128
    return qt


def global_attention_general(x, context, conv_weight, *, q_tile=512,
                             use_bf16_matmul=False):
    """Forward pass of GlobalAttentionGeneral (mask == None).

    x           : (B, idf, ih, iw)   float32 (NCHW, like PyTorch)
    context     : (B, cdf, sourceL)  float32
    conv_weight : (idf, cdf)         float32 (1x1 conv weight, kernel dims squeezed)
    returns (weightedContext (B, idf, ih, iw), attn (B, sourceL, ih, iw))
    """
    # TODO(synk): mask path (applyMask / masked_fill before softmax) not implemented;
    #             this covers the default forward where self.mask is None.
    B, idf, ih, iw = x.shape
    _, cdf, sourceL = context.shape
    queryL = ih * iw

    # view(B, idf, queryL) -- no HBM-level transpose; queryL stays the lane axis.
    target = x.reshape(B, idf, queryL)

    # Hoist the 1x1 conv (channel matmul) out of the kernel so it is not recomputed
    # per query tile. Both results are tiny compared to target/outputs.
    sourceT = jnp.einsum("oc,bcl->bol", conv_weight, context)      # (B, idf, sourceL)
    sourceT_t = jnp.transpose(sourceT, (0, 2, 1))                  # (B, sourceL, idf)

    qt = _pick_query_tile(queryL, q_tile)
    n_qt = queryL // qt

    compute_dtype = jnp.bfloat16 if use_bf16_matmul else jnp.float32
    kernel = functools.partial(_global_attention_kernel, compute_dtype=compute_dtype)

    out_shapes = (
        jax.ShapeDtypeStruct((B, idf, queryL), x.dtype),
        jax.ShapeDtypeStruct((B, sourceL, queryL), x.dtype),
    )

    grid_spec = pltpu.PrefetchScalarGridSpec(
        num_scalar_prefetch=0,
        grid=(B, n_qt),
        in_specs=[
            pl.BlockSpec((1, idf, qt), lambda b, q: (b, 0, q)),          # target tile
            pl.BlockSpec((1, idf, sourceL), lambda b, q: (b, 0, 0)),     # sourceT
            pl.BlockSpec((1, sourceL, idf), lambda b, q: (b, 0, 0)),     # sourceT^T
        ],
        out_specs=[
            pl.BlockSpec((1, idf, qt), lambda b, q: (b, 0, q)),          # weightedContext
            pl.BlockSpec((1, sourceL, qt), lambda b, q: (b, 0, q)),      # attn (transposed)
        ],
    )

    wc, attn = pl.pallas_call(
        kernel,
        out_shape=out_shapes,
        grid_spec=grid_spec,
        compiler_params=pltpu.CompilerParams(
            # Both axes independent -> megacore sharding on v7x (2 TCs/chip).
            dimension_semantics=("parallel", "parallel"),
            # Explicit, conservative VMEM budget (safe on v5e/v6e/v7x); the
            # double-buffered working set per step is far below this.
            vmem_limit_bytes=32 * 1024 * 1024,
        ),
    )(target, sourceT, sourceT_t)

    weightedContext = wc.reshape(B, idf, ih, iw)
    attn = attn.reshape(B, sourceL, ih, iw)
    return weightedContext, attn


def _reference(x, context, conv_weight):
    """Pure-JAX reference mirroring the PyTorch forward."""
    B, idf, ih, iw = x.shape
    _, cdf, sourceL = context.shape
    queryL = ih * iw
    target = x.reshape(B, idf, queryL)
    targetT = jnp.transpose(target, (0, 2, 1))                     # (B, queryL, idf)
    sourceT = jnp.einsum("oc,bcl->bol", conv_weight, context)      # (B, idf, sourceL)
    attn = jnp.einsum("bqi,bil->bql", targetT, sourceT)            # (B, queryL, sourceL)
    attn = jax.nn.softmax(attn, axis=-1)
    attnT = jnp.transpose(attn, (0, 2, 1))                         # (B, sourceL, queryL)
    wc = jnp.einsum("bil,blq->biq", sourceT, attnT)                # (B, idf, queryL)
    return wc.reshape(B, idf, ih, iw), attnT.reshape(B, sourceL, ih, iw)


if __name__ == "__main__":
    # Small shapes consistent with the module: batch=2, idf=4, cdf=8, ih=iw=16, sourceL=8.
    # queryL = 256 with q_tile=128 exercises the queryL grid axis (2 tiles / batch).
    B, idf, cdf = 2, 4, 8
    ih = iw = 16
    sourceL = 8

    key = jax.random.PRNGKey(0)
    k1, k2, k3 = jax.random.split(key, 3)
    x = jax.random.normal(k1, (B, idf, ih, iw), dtype=jnp.float32)
    context = jax.random.normal(k2, (B, cdf, sourceL), dtype=jnp.float32)
    # conv1x1 weight: nn.Conv2d(cdf, idf, 1, bias=False) -> (idf, cdf, 1, 1); squeezed.
    conv_weight = (jax.random.uniform(k3, (idf, cdf), dtype=jnp.float32) - 0.5) * (
        2.0 / jnp.sqrt(cdf)
    )

    wc, attn = global_attention_general(x, context, conv_weight, q_tile=128)
    jax.block_until_ready((wc, attn))

    wc_ref, attn_ref = _reference(x, context, conv_weight)
    assert wc.shape == (B, idf, ih, iw)
    assert attn.shape == (B, sourceL, ih, iw)
    # Tolerance accommodates the approximate (EUP) reciprocal in the softmax.
    assert jnp.allclose(wc, wc_ref, atol=5e-3, rtol=5e-3)
    assert jnp.allclose(attn, attn_ref, atol=5e-3, rtol=5e-3)

    print("KERNEL_OK")
</pallas_src>

<mosaic_0001>
module attributes {stable_mosaic.version = 11 : i64} {
  func.func @_global_attention_kernel(%arg0: i32, %arg1: i32, %arg2: memref<1x4x128xf32, #tpu.memory_space<vmem>>, %arg3: memref<1x4x8xf32, #tpu.memory_space<vmem>>, %arg4: memref<1x8x4xf32, #tpu.memory_space<vmem>>, %arg5: memref<1x4x128xf32, #tpu.memory_space<vmem>>, %arg6: memref<1x8x128xf32, #tpu.memory_space<vmem>>) attributes {dimension_semantics = [#tpu.dimension_semantics<parallel>, #tpu.dimension_semantics<parallel>], iteration_bounds = array<i64: 2, 2>, scalar_prefetch = 0 : i64, scratch_operands = 0 : i64, tpu.core_type = #tpu.core_type<tc>, window_params = [{transform_indices = @transform_0, window_bounds = array<i64: 1, 4, 128>}, {transform_indices = @transform_1, window_bounds = array<i64: 1, 4, 8>}, {transform_indices = @transform_2, window_bounds = array<i64: 1, 8, 4>}, {transform_indices = @transform_3, window_bounds = array<i64: 1, 4, 128>}, {transform_indices = @transform_4, window_bounds = array<i64: 1, 8, 128>}]} {
    %c0 = arith.constant 0 : index
    %c0_0 = arith.constant 0 : index
    %c0_1 = arith.constant 0 : index
    %0 = vector.load %arg2[%c0, %c0_0, %c0_1] : memref<1x4x128xf32, #tpu.memory_space<vmem>>, vector<1x4x128xf32>
    %1 = vector.shape_cast %0 : vector<1x4x128xf32> to vector<4x128xf32>
    %c0_2 = arith.constant 0 : index
    %c0_3 = arith.constant 0 : index
    %c0_4 = arith.constant 0 : index
    %2 = vector.load %arg3[%c0_2, %c0_3, %c0_4] : memref<1x4x8xf32, #tpu.memory_space<vmem>>, vector<1x4x8xf32>
    %3 = vector.shape_cast %2 : vector<1x4x8xf32> to vector<4x8xf32>
    %c0_5 = arith.constant 0 : index
    %c0_6 = arith.constant 0 : index
    %c0_7 = arith.constant 0 : index
    %4 = vector.load %arg4[%c0_5, %c0_6, %c0_7] : memref<1x8x4xf32, #tpu.memory_space<vmem>>, vector<1x8x4xf32>
    %5 = vector.shape_cast %4 : vector<1x8x4xf32> to vector<8x4xf32>
    %cst = arith.constant dense<0.000000e+00> : vector<8x128xf32>
    %6 = tpu.matmul %5, %1, %cst {dimension_numbers = #tpu.dot_dimension_numbers<[1], [0], [0], [1], [0, 0, 1, 1], [], []>} : vector<8x4xf32>, vector<4x128xf32>, vector<8x128xf32> -> vector<8x128xf32>
    %cst_8 = arith.constant dense<0xFF800000> : vector<128xf32>
    %7 = vector.multi_reduction <maximumf>, %6, %cst_8 [0] : vector<8x128xf32> to vector<128xf32>
    %8 = vector.shape_cast %7 : vector<128xf32> to vector<1x128xf32>
    %9 = vector.broadcast %8 : vector<1x128xf32> to vector<8x128xf32>
    %10 = arith.subf %6, %9 : vector<8x128xf32>
    %11 = math.exp %10 : vector<8x128xf32>
    %cst_9 = arith.constant dense<0.000000e+00> : vector<128xf32>
    %12 = vector.multi_reduction <add>, %11, %cst_9 [0] : vector<8x128xf32> to vector<128xf32>
    %13 = vector.shape_cast %12 : vector<128xf32> to vector<1x128xf32>
    %14 = tpu.reciprocal %13 {approx = true} : vector<1x128xf32> -> vector<1x128xf32>
    %15 = vector.broadcast %14 : vector<1x128xf32> to vector<8x128xf32>
    %16 = arith.mulf %11, %15 : vector<8x128xf32>
    %cst_10 = arith.constant dense<0.000000e+00> : vector<4x128xf32>
    %17 = tpu.matmul %3, %16, %cst_10 {dimension_numbers = #tpu.dot_dimension_numbers<[1], [0], [0], [1], [0, 0, 1, 1], [], []>} : vector<4x8xf32>, vector<8x128xf32>, vector<4x128xf32> -> vector<4x128xf32>
    %c0_11 = arith.constant 0 : index
    %c0_12 = arith.constant 0 : index
    %c0_13 = arith.constant 0 : index
    %18 = vector.load %arg5[%c0_11, %c0_12, %c0_13] : memref<1x4x128xf32, #tpu.memory_space<vmem>>, vector<1x4x128xf32>
    %19 = vector.shape_cast %18 : vector<1x4x128xf32> to vector<4x128xf32>
    %20 = vector.shape_cast %17 : vector<4x128xf32> to vector<1x4x128xf32>
    tpu.vector_store %arg5[%c0_11, %c0_12, %c0_13], %20 {strides = array<i32>} : memref<1x4x128xf32, #tpu.memory_space<vmem>>, vector<1x4x128xf32>,
    %c0_14 = arith.constant 0 : index
    %c0_15 = arith.constant 0 : index
    %c0_16 = arith.constant 0 : index
    %21 = vector.load %arg6[%c0_14, %c0_15, %c0_16] : memref<1x8x128xf32, #tpu.memory_space<vmem>>, vector<1x8x128xf32>
    %22 = vector.shape_cast %21 : vector<1x8x128xf32> to vector<8x128xf32>
    %23 = vector.shape_cast %16 : vector<8x128xf32> to vector<1x8x128xf32>
    tpu.vector_store %arg6[%c0_14, %c0_15, %c0_16], %23 {strides = array<i32>} : memref<1x8x128xf32, #tpu.memory_space<vmem>>, vector<1x8x128xf32>,
    return
  }
  func.func @transform_0(%arg0: i32, %arg1: i32) -> (i32, i32, i32) {
    %c0_i32 = arith.constant 0 : i32
    %c0_i32_0 = arith.constant 0 : i32
    return %arg0, %c0_i32, %arg1 : i32, i32, i32
  }
  func.func @transform_1(%arg0: i32, %arg1: i32) -> (i32, i32, i32) {
    %c0_i32 = arith.constant 0 : i32
    %c0_i32_0 = arith.constant 0 : i32
    %c0_i32_1 = arith.constant 0 : i32
    return %arg0, %c0_i32, %c0_i32_0 : i32, i32, i32
  }
  func.func @transform_2(%arg0: i32, %arg1: i32) -> (i32, i32, i32) {
    %c0_i32 = arith.constant 0 : i32
    %c0_i32_0 = arith.constant 0 : i32
    %c0_i32_1 = arith.constant 0 : i32
    return %arg0, %c0_i32, %c0_i32_0 : i32, i32, i32
  }
  func.func @transform_3(%arg0: i32, %arg1: i32) -> (i32, i32, i32) {
    %c0_i32 = arith.constant 0 : i32
    %c0_i32_0 = arith.constant 0 : i32
    return %arg0, %c0_i32, %arg1 : i32, i32, i32
  }
  func.func @transform_4(%arg0: i32, %arg1: i32) -> (i32, i32, i32) {
    %c0_i32 = arith.constant 0 : i32
    %c0_i32_0 = arith.constant 0 : i32
    return %arg0, %c0_i32, %arg1 : i32, i32, i32
  }
}

</mosaic_0001>

<bundles_post_ra>
// kernel: tpu_custom_call.1
= control target key start
LH: loop header
LB: loop body
LE: loop exit
PB: predicated region body
PF: predicated region fallthrough
CT: control target
= control target key end

     0   :  { %10 = vsyncpa [#allocation3], 0  ;;  %s1069_s0 = inlined_call_operand.vmem [shape: f32[2,4,256], index: 0, kind: input, shape index: {}]   ;;  %s1070_s1 = inlined_call_operand.vmem [shape: f32[2,4,8], index: 1, kind: input, shape index: {}]   ;;  %s1071_s2 = inlined_call_operand.vmem [shape: f32[2,8,4], index: 2, kind: input, shape index: {}]   ;;  %s1072_s3 = inlined_call_operand.hbm [shape: f32[2,4,256], index: 3, kind: output, shape index: {0}]   ;;  %s1073_s4 = inlined_call_operand.hbm [shape: f32[2,8,256], index: 4, kind: output, shape index: {1}]  }
   0x1   :  { %12 = vsyncpa [#allocation3 + $0x1], 0 }
   0x2   :  { %13 = vsyncpa [#allocation5], 0 }
   0x3   :  { %15 = vsyncpa [#allocation5 + $0x1], 0  ;;  %s889_s15 = smov 0   ;;  %s891_s16 = smov 0  }
   0x4   :  { %s893_s17 = smov 0   ;;  %s895_s18 = smov 0  }
   0x5   :  { %s897_s19 = smov 0   ;;  %s899_s20 = smov 0  }
   0x6   :  { %s901_s21 = smov 0   ;;  %s903_s22 = smov 0  }
   0x7 LB: > { %s614_s23 = sadd.s32 4294967295, %s858_s22   ;;  %s615_s24 = sadd.s32 4294967294, %s858_s22   ;;  %s858_s22 = sphi %s903_s22, %s21_s22   ;;  %s854_s21 = sphi %s901_s21, %s1082_s21   ;;  %s850_s20 = sphi %s899_s20, %s1081_s20   ;;  %s846_s19 = sphi %s897_s19, %s1080_s19   ;;  %s842_s18 = sphi %s895_s18, %s1079_s18   ;;  %s838_s17 = sphi %s893_s17, %s1078_s17   ;;  %s834_s16 = sphi %s891_s16, %s1077_s16   ;;  %s830_s15 = sphi %s889_s15, %s1076_s15  }
   0x8   : > { %s30_s25 = sadd.s32 1, %s850_s20  ;;  %s33_s26 = sadd.s32 1, %s854_s21 }
   0x9   : > { %p31_p0 = scmp.ge.s32.totalorder %s30_s25, 2  ;;  %p132_p1 = scmp.ne.s32.totalorder %s838_s17, %s834_s16 }
   0xa   : > { %p133_p2 = scmp.eq.s32.totalorder %s614_s23, 3  ;;  %p138_p5 = scmp.ne.s32.totalorder %s834_s16, %s830_s15 }
   0xb   : > { %s1084_s25 = smov (%p31_p0, %s30_s25), 0  ;;  %s1086_s26 = smov (!%p31_p0, %s33_s26), %s854_s21 }
   0xc   : > { %s118_s27 = ssub.s32 %s850_s20, %s1084_s25  ;;  %p940_p3 = por %p133_p2, %p132_p1 }
   0xd   : > { %p35_p4 = scmp.ge.s32.totalorder %s1086_s26, 2  ;;  %p139_p6 = scmp.eq.s32.totalorder %s615_s24, 3 }
   0xe   : > { %p618_p7 = scmp.ge.s32.totalorder %s858_s22, 1  ;;  %p210_p9 = scmp.lt.s32.totalorder %s858_s22, 5 }
   0xf   : > { %s1088_s26 = smov (%p35_p4, %s1086_s26), 0  ;;  %p949_p8 = por %p139_p6, %p138_p5 }
  0x10   : > { %s117_s30 = ssub.s32 %s854_s21, %s1088_s26  ;;  %s122_s5 = sadd.s32 1, %s838_s17 }
  0x11   : > { %s119_s6 = sor.u32 %s118_s27, %s117_s30  ;;  %p211_p10 = pnand %p618_p7, %p210_p9 }
  0x12   : > { %p120_p11 = scmp.eq.s32.totalorder %s119_s6, 0  ;;  %p252_p12 = scmp.lt.s32.totalorder (!%p211_p10), %s846_s19, 1  ;;  %v860_v0 = vmov (!%p211_p10), 0.0   ;;  %vm861_vm0 = vmmov (!%p211_p10), 0   ;;  %vm275_vm1 = vcmask (!%p211_p10), 1043456   ;;  %vm271_vm2 = vcmask (!%p211_p10), 31744  }
  0x13   : > { %214 = sbr.rel (%p211_p10) target bundleno = 525 (0x20d), region = 32  ;;  %p254_p13 = scmp.lt.s32.totalorder (!%p211_p10), %s842_s18, 1  ;;  %640 = vmatprep.subr.mxu0 (!%p211_p10), %v860_v0  ;;  %642 = vmatprep.mubr.msk.f32.mxu0 (!%p211_p10), %vm861_vm0, %v860_v0  ;;  %vm366_vm3 = vcmask (!%p211_p10), 64512  }
  0x14   : > { %s958_s7 = scalar_select %p120_p11, %s838_s17, %s122_s5  }
  0x15   : > { %645 = vmatprep.subr.mxu1 (!%p211_p10), %v860_v0  ;;  %647 = vmatprep.mubr.msk.f32.mxu1 (!%p211_p10), %vm861_vm0, %v860_v0  ;;  %s975_s6 = sand.u32 (!%p211_p10), 1, %s834_s16  }
  0x1a   : > { %s963_s8 = scalar_select %p252_p12, %s846_s19, 1 }
  0x1b   : > { %s255_s9 = scalar_select %p254_p13, %s842_s18, 1 }
  0x1c   : > { %s621_s10 = sshll.u32 %s963_s8, 1  ;;  %s624_s11 = sshll.u32 %s963_s8, 3 }
  0x1d   : > { %s257_s12 = sadd.s32 %s621_s10, %s255_s9  ;;  %s267_s23 = scalar_lea.vmem %s1071_s2, %s624_s11 }
  0x1e   : > { %s622_s24 = sshll.u32 %s257_s12, 2  ;;  %v270_v1 = vld [vmem:[%s267_s23] sm:$0xff]  ;;  %s623_s9 = sshll.u32 %s963_s8, 2 }
  0x1f   : > { %s259_s5 = scalar_lea.vmem %s1069_s0, %s622_s24  ;;  %s620_s10 = sshll.u32 %s975_s6, 3 }
  0x20   : > { %v268_v2 = vld [vmem:[%s259_s5] sm:$0xf]  ;;  %s263_s13 = scalar_lea.vmem %s1070_s1, %s623_s9  ;;  %s251_s14 = scalar_lea.vmem [#allocation4], %s620_s10 }
  0x21   : > { %641 = vmatpush3.msk.msra.mxu0 %vm275_vm1, %v268_v2  ;;  %v269_v22 = vld [vmem:[%s263_s13] sm:$0xf]  ;;  %s630_s23 = sshll.u32 %s846_s19, 1  ;;  %s478_s27 = sshll.u32 %s251_s14, 4  ;;  %s479_s27 = int_to_ptr.vmem [resolvable:$true] %s478_s27 }
  0x22   : > { %643 = vmatmul.mubr.msk.f32.vlgmr.msra.gmra.mrb[0].mxu0 %vm271_vm2, %v270_v1  ;;  %s984_s24 = sadd.s32 %s842_s18, %s630_s23  ;;  %s448_s9 = scalar_lea.sflag [#allocation5], %s975_s6 }
  0x23   : > { %s633_s8 = sshll.u32 %s984_s24, 7  ;;  %s732_s12 = scalar_lea.vmem %s479_s27, 128 }
  0x24   : > { %s990_s11 = scalar_lea.hbm %s1073_s4, %s633_s8  ;;  %p733_p0 = scmp.ne.s32.totalorder %s479_s27, %s732_s12 }
  0x25   : > { %s862_s10 = smov [#allocation4]  }
  0x26   : > { %p734_p1 = pnand %p733_p0, %p940_p3  ;;  %s736_s13 = sshll.u32 %s862_s10, 4  ;;  %s737_s13 = int_to_ptr.vmem [resolvable:$false] %s736_s13 }
  0x27   : > { %s738_s18 = scalar_lea.vmem %s737_s13, 256  ;;  %p739_p4 = scmp.lt.s32.totalorder %s479_s27, %s737_s13 }
  0x28   : > { %p735_p2 = pneg %p734_p1  ;;  %p740_p5 = scmp.lt.s32.totalorder %s738_s18, %s732_s12 }
  0x2a   : > { %p741_p6 = por %p740_p5, %p739_p4 }
  0x2c   : > { %p742_p7 = pnand %p741_p6, %p735_p2 }
  0xf5   : > { %v345_v3 = vpop.f32.mrb[0].mxu0 }
  0xf6   : > { %v349_v4 = vrot.slane %v345_v3, 4  ;;  %v644_v5 = vpop.f32.mrb[1].mxu0 }
  0xf8   : > { %v350_v6 = vmax.f32 %v345_v3, %v349_v4 }
  0xfa   : > { %v351_v7 = vrot.slane %v350_v6, 2 }
  0xfc   : > { %v352_v8 = vmax.f32 %v350_v6, %v351_v7 }
  0xfe   : > { %v353_v9 = vrot.slane %v352_v8, 1 }
 0x100   : > { %v354_v10 = vmax.f32 %v352_v8, %v353_v9 }
 0x102   : > { %v355_v11 = vsub.f32 %v345_v3, %v354_v10 }
 0x104   : > { %v356_v12 = vmul.f32 1.442695, %v355_v11 }
 0x106   : > { %728 = vpow2.f32 %v356_v12 }
 0x110   : > { %v729_v13 = vpop.eup %728 }
 0x111   : > { %v358_v14 = vrot.slane %v729_v13, 4 }
 0x113   : > { %v359_v15 = vadd.f32 %v729_v13, %v358_v14 }
 0x115   : > { %v360_v16 = vrot.slane %v359_v15, 2 }
 0x117   : > { %v361_v17 = vadd.f32 %v360_v16, %v359_v15 }
 0x119   : > { %v362_v18 = vrot.slane %v361_v17, 1 }
 0x11b   : > { %v363_v19 = vadd.f32 %v362_v18, %v361_v17 }
 0x11d   : > { %730 = vrcp.f32 %v363_v19 }
 0x127   : > { %v731_v20 = vpop.eup %730 }
 0x128   : > { %v365_v21 = vmul.f32 %v731_v20, %v729_v13 }
 0x12a   : > { %646 = vmatpush3.msra.mxu1 %v365_v21  ;;  %441 = vst [vmem:[%s251_s14] sm:$0xff] %v365_v21 }
 0x12b   : > { %648 = vmatmul.mubr.msk.f32.vlgmr.msra.gmra.mrb[0].mxu1 %vm366_vm3, %v269_v22 }
 0x12c   : > { %745 = shalt.err (!%p742_p7)
}
 0x12d   : > { %s746_s19 = scalar_lea.hbm %s990_s11, 128  ;;  %s750_s8 = scalar_lea.hbm %s1073_s4, 512 }
 0x12e   : > { %p747_p9 = scmp.ne.s32.totalorder %s990_s11, %s746_s19  ;;  %p751_p12 = scmp.lt.u32.totalorder %s990_s11, %s1073_s4 }
 0x12f   : > { %p752_p13 = scmp.lt.u32.totalorder %s750_s8, %s746_s19  ;;  %p754_p1 = scmp.lt.u32.totalorder %s746_s19, %s990_s11 }
 0x130   : > { %p748_p10 = pnand %p747_p9, %p940_p3 }
 0x131   : > { %p753_p0 = por %p752_p13, %p751_p12 }
 0x132   : > { %p749_p11 = pneg %p748_p10 }
 0x133   : > { %p755_p2 = por %p754_p1, %p753_p0 }
 0x135   : > { %p756_p4 = pnand %p755_p2, %p749_p11 }
 0x137   : > { %759 = shalt.err (!%p756_p4)
}
 0x138   : > { %651 = dma.vmem_to_hbm [thread:$0]  (%p940_p3), %s479_s27, 128, %s990_s11, %s448_s9  }
 0x139   : > { %s619_s12 = sshll.u32 %s975_s6, 2  ;;  %s631_s18 = sshll.u32 %s984_s24, 6 }
 0x13a   : > { %s244_s10 = scalar_lea.vmem [#allocation2], %s619_s12  ;;  %s1017_s19 = scalar_lea.hbm %s1072_s3, %s631_s18 }
 0x13b   : > { %s463_s13 = sshll.u32 %s244_s10, 4  ;;  %s443_s8 = scalar_lea.sflag [#allocation3], %s975_s6  ;;  %s1012_s13 = int_to_ptr.vmem [resolvable:$true] %s463_s13 }
 0x13c   : > { %s760_s30 = scalar_lea.vmem %s1012_s13, 64  ;;  %s863_s24 = smov [#allocation2]  }
 0x13d   : > { %p761_p5 = scmp.ne.s32.totalorder %s1012_s13, %s760_s30  ;;  %s764_s27 = sshll.u32 %s863_s24, 4  ;;  %s765_s27 = int_to_ptr.vmem [resolvable:$false] %s764_s27 }
 0x13e   : > { %s766_s11 = scalar_lea.vmem %s765_s27, 128  ;;  %p767_p9 = scmp.lt.s32.totalorder %s1012_s13, %s765_s27 }
 0x13f   : > { %p762_p6 = pnand %p761_p5, %p940_p3  ;;  %p768_p10 = scmp.lt.s32.totalorder %s766_s11, %s760_s30 }
 0x141   : > { %p763_p7 = pneg %p762_p6  ;;  %p769_p11 = por %p768_p10, %p767_p9 }
 0x143   : > { %p770_p12 = pnand %p769_p11, %p763_p7 }
 0x1fe   : > { %v436_v23 = vpop.f32.mrb[0].mxu1 }
 0x1ff   : > { %440 = vst [vmem:[%s244_s10] sm:$0xf] %v436_v23  ;;  %v649_v24 = vpop.f32.mrb[1].mxu1 }
 0x200   : > { %773 = shalt.err (!%p770_p12)
}
 0x201   : > { %s774_s6 = scalar_lea.hbm %s1017_s19, 64  ;;  %s778_s12 = scalar_lea.hbm %s1072_s3, 256 }
 0x202   : > { %p775_p13 = scmp.ne.s32.totalorder %s1017_s19, %s774_s6  ;;  %p779_p2 = scmp.lt.u32.totalorder %s1017_s19, %s1072_s3 }
 0x203   : > { %p780_p4 = scmp.lt.u32.totalorder %s778_s12, %s774_s6  ;;  %p782_p6 = scmp.lt.u32.totalorder %s774_s6, %s1017_s19 }
 0x204   : > { %p776_p0 = pnand %p775_p13, %p940_p3 }
 0x205   : > { %p781_p5 = por %p780_p4, %p779_p2 }
 0x206   : > { %p777_p1 = pneg %p776_p0 }
 0x207   : > { %p783_p7 = por %p782_p6, %p781_p5 }
 0x209   : > { %p784_p9 = pnand %p783_p7, %p777_p1 }
 0x20b   : > { %787 = shalt.err (!%p784_p9)
}
 0x20c   : > { %650 = dma.vmem_to_hbm [thread:$0]  (%p940_p3), %s1012_s13, 64, %s1017_s19, %s443_s8  }
 0x20d PF: > { %p661_p10 = scmp.ge.s32.totalorder %s858_s22, 2  ;;  %s490_s14 = sand.u32 1, %s830_s15  }
 0x20e   : > { %s491_s23 = scalar_lea.sflag [#allocation3], %s490_s14 }
 0x20f   : > { %p655_p11 = pnand %p661_p10, %p949_p8 }
 0x211   : > { %821 = dma.done.wait (!%p655_p11), %s491_s23, 64  }
 0x212   : > { %823 = vsyncadd (!%p655_p11), %s491_s23, 4294967232  ;;  %s500_s30 = scalar_lea.sflag [#allocation5], %s490_s14 }
 0x213   : > { %825 = dma.done.wait (!%p655_p11), %s500_s30, 128  }
 0x214   : > { %827 = vsyncadd (!%p655_p11), %s500_s30, 4294967168  ;;  %s21_s22 = sadd.s32 1, %s858_s22   ;;  %s1076_s15 = smov %s834_s16 }
 0x215   : > { %p18_p12 = scmp.ge.s32.totalorder %s21_s22, 6   ;;  %s1077_s16 = smov %s838_s17 }
 0x216   : > { %s1078_s17 = smov %s958_s7  ;;  %s1079_s18 = smov %s850_s20 }
 0x217   : > { %s1080_s19 = smov %s854_s21  ;;  %s1081_s20 = smov %s1084_s25 }
 0x218   : > { %s1082_s21 = smov %s1088_s26  ;;  %20 = sbr.rel (!%p18_p12) target bundleno = 7 (0x7), region = 90 }
 0x21f   :  { %505 = vsyncpa [#allocation3], 1 }
 0x220   :  { %507 = vsyncpa [#allocation3 + $0x1], 1 }
 0x221   :  { %508 = vsyncpa [#allocation5], 1 }
 0x222   :  { %510 = vsyncpa [#allocation5 + $0x1], 1 }

</bundles_post_ra>
